<compile_context>
chip_gen: v6e
topology: v6e:2x2x1
jax: 0.10.0
libtpu: 0.0.40
codegen_flags: <defaults>
</compile_context>

<pallas_src>
import jax
import jax.numpy as jnp
from jax.experimental import pallas as pl
from jax.experimental.pallas import tpu as pltpu

_LANE = 128


def _round_up(x, m):
    return ((x + m - 1) // m) * m


def _affine_kernel(z_ref, w_ref, b_ref, out_ref):
    """One lane-padded matmul + bias per batch tile; narrow (TB, C) store."""
    c = out_ref.shape[-1]
    acc = jnp.dot(z_ref[...], w_ref[...], preferred_element_type=jnp.float32)
    acc = acc + b_ref[...]
    out_ref[...] = acc[:, :c].astype(out_ref.dtype)


def collapse_params(params):
    """Fold the purely-affine 4-layer stack into a single (z_dim, out) affine map."""
    (w_eff, b_eff) = params[0]
    for (w, b) in params[1:]:
        w_eff = jnp.dot(w_eff, w, preferred_element_type=jnp.float32)
        b_eff = jnp.dot(b_eff, w, preferred_element_type=jnp.float32) + b
    return w_eff, b_eff


def generator_forward(z, params, *, block_b=4096):
    """z: (B, z_dim) float32 -> (B, 3, 1, 1) float32 (channels-first output)."""
    B, z_dim = z.shape

    # Algorithmic collapse: 4 Linear layers with no activation == one affine map.
    w_eff, b_eff = collapse_params(params)          # (z_dim, C), (1, C)
    C = w_eff.shape[1]

    # Lane-pad the (tiny, resident) weights/bias so the MXU operand is full
    # width; the HBM output stays narrow (sliced in-register in the kernel).
    Cp = _round_up(C, _LANE)
    w_pad = jnp.pad(w_eff, ((0, 0), (0, Cp - C)))
    b_pad = jnp.pad(b_eff, ((0, 0), (0, Cp - C)))

    # Batch tiling: pad B to a multiple of the tile; tile is a multiple of 8 sublanes.
    TB = min(block_b, _round_up(B, 8))
    Bp = _round_up(B, TB)
    z_p = jnp.pad(z, ((0, Bp - B), (0, 0))) if Bp != B else z

    out = pl.pallas_call(
        _affine_kernel,
        out_shape=jax.ShapeDtypeStruct((Bp, C), jnp.float32),
        grid=(Bp // TB,),
        in_specs=[
            pl.BlockSpec((TB, z_dim), lambda i: (i, 0)),   # streamed per tile
            pl.BlockSpec((z_dim, Cp), lambda i: (0, 0)),   # resident weights
            pl.BlockSpec((1, Cp), lambda i: (0, 0)),       # resident bias
        ],
        out_specs=pl.BlockSpec((TB, C), lambda i: (i, 0)),  # narrow HBM writeback
        compiler_params=pltpu.CompilerParams(
            dimension_semantics=("parallel",),  # v7x: shard batch tiles across 2 TCs
        ),
    )(z_p, w_pad, b_pad)

    if Bp != B:
        out = out[:B]
    # Match the module's (B, C, 1, 1) NCHW-style output convention.
    return out.reshape(B, C, 1, 1)


def init_generator_params(key, z_dim=100, mlp_dim=64, out_dim=3):
    """Deterministic PyTorch-style (uniform +/- 1/sqrt(fan_in)) init."""
    dims = [(z_dim, mlp_dim), (mlp_dim, mlp_dim), (mlp_dim, mlp_dim), (mlp_dim, out_dim)]
    params = []
    for (fan_in, fan_out) in dims:
        key, kw, kb = jax.random.split(key, 3)
        bound = 1.0 / jnp.sqrt(fan_in)
        # Stored as (in_features, out_features) so the math is x @ W + b,
        # which equals PyTorch's x @ W_pt.T + b.
        w = jax.random.uniform(kw, (fan_in, fan_out), jnp.float32, -bound, bound)
        b = jax.random.uniform(kb, (1, fan_out), jnp.float32, -bound, bound)
        params.append((w, b))
    return params


def reference_forward(z, params):
    """Pure-JAX reference: the original (uncollapsed) 4-layer chain."""
    h = z
    for (w, b) in params:
        h = h @ w + b
    return h.reshape(z.shape[0], -1, 1, 1)


if __name__ == "__main__":
    key = jax.random.PRNGKey(0)
    k_params, k_z = jax.random.split(key)

    B, Z_DIM, MLP_DIM = 8, 100, 64
    params = init_generator_params(k_params, z_dim=Z_DIM, mlp_dim=MLP_DIM, out_dim=3)
    z = jax.random.normal(k_z, (B, Z_DIM), dtype=jnp.float32)

    fwd = jax.jit(generator_forward)
    out = jax.block_until_ready(fwd(z, params))

    ref = reference_forward(z, params)
    assert out.shape == (B, 3, 1, 1), out.shape
    assert jnp.allclose(out, ref, atol=1e-4, rtol=1e-4), "mismatch vs JAX reference"

    print("KERNEL_OK")
</pallas_src>

<mosaic_0001>
module attributes {stable_mosaic.version = 11 : i64} {
  func.func @_affine_kernel(%arg0: i32, %arg1: memref<8x100xf32, #tpu.memory_space<vmem>>, %arg2: memref<100x128xf32, #tpu.memory_space<vmem>>, %arg3: memref<1x128xf32, #tpu.memory_space<vmem>>, %arg4: memref<8x3xf32, #tpu.memory_space<vmem>>) attributes {dimension_semantics = [#tpu.dimension_semantics<parallel>], iteration_bounds = array<i64: 1>, scalar_prefetch = 0 : i64, scratch_operands = 0 : i64, tpu.core_type = #tpu.core_type<tc>, window_params = [{transform_indices = @transform_0, window_bounds = array<i64: 8, 100>}, {pipeline_mode = #tpu.pipeline_mode<synchronous>, transform_indices = @transform_1, window_bounds = array<i64: 100, 128>}, {pipeline_mode = #tpu.pipeline_mode<synchronous>, transform_indices = @transform_2, window_bounds = array<i64: 1, 128>}, {transform_indices = @transform_3, window_bounds = array<i64: 8, 3>}]} {
    %c0 = arith.constant 0 : index
    %c0_0 = arith.constant 0 : index
    %0 = vector.load %arg1[%c0, %c0_0] : memref<8x100xf32, #tpu.memory_space<vmem>>, vector<8x100xf32>
    %c0_1 = arith.constant 0 : index
    %c0_2 = arith.constant 0 : index
    %1 = vector.load %arg2[%c0_1, %c0_2] : memref<100x128xf32, #tpu.memory_space<vmem>>, vector<100x128xf32>
    %cst = arith.constant dense<0.000000e+00> : vector<8x128xf32>
    %2 = tpu.matmul %0, %1, %cst {dimension_numbers = #tpu.dot_dimension_numbers<[1], [0], [0], [1], [0, 0, 1, 1], [], []>} : vector<8x100xf32>, vector<100x128xf32>, vector<8x128xf32> -> vector<8x128xf32>
    %c0_3 = arith.constant 0 : index
    %c0_4 = arith.constant 0 : index
    %3 = vector.load %arg3[%c0_3, %c0_4] : memref<1x128xf32, #tpu.memory_space<vmem>>, vector<1x128xf32>
    %4 = vector.broadcast %3 : vector<1x128xf32> to vector<8x128xf32>
    %5 = arith.addf %2, %4 : vector<8x128xf32>
    %6 = vector.extract_strided_slice %5 {offsets = [0, 0], sizes = [8, 3], strides = [1, 1]} : vector<8x128xf32> to vector<8x3xf32>
    %c0_5 = arith.constant 0 : index
    %c0_6 = arith.constant 0 : index
    %7 = vector.load %arg4[%c0_5, %c0_6] : memref<8x3xf32, #tpu.memory_space<vmem>>, vector<8x3xf32>
    tpu.vector_store %arg4[%c0_5, %c0_6], %6 {strides = array<i32>} : memref<8x3xf32, #tpu.memory_space<vmem>>, vector<8x3xf32>,
    return
  }
  func.func @transform_0(%arg0: i32) -> (i32, i32) {
    %c0_i32 = arith.constant 0 : i32
    %c0_i32_0 = arith.constant 0 : i32
    return %arg0, %c0_i32 : i32, i32
  }
  func.func @transform_1(%arg0: i32) -> (i32, i32) {
    %c0_i32 = arith.constant 0 : i32
    %c0_i32_0 = arith.constant 0 : i32
    %c0_i32_1 = arith.constant 0 : i32
    return %c0_i32, %c0_i32_0 : i32, i32
  }
  func.func @transform_2(%arg0: i32) -> (i32, i32) {
    %c0_i32 = arith.constant 0 : i32
    %c0_i32_0 = arith.constant 0 : i32
    %c0_i32_1 = arith.constant 0 : i32
    return %c0_i32, %c0_i32_0 : i32, i32
  }
  func.func @transform_3(%arg0: i32) -> (i32, i32) {
    %c0_i32 = arith.constant 0 : i32
    %c0_i32_0 = arith.constant 0 : i32
    return %arg0, %c0_i32 : i32, i32
  }
}

</mosaic_0001>

<bundles_post_ra>
// kernel: generator_forward.1
= control target key start
LH: loop header
LB: loop body
LE: loop exit
PB: predicated region body
PF: predicated region fallthrough
CT: control target
= control target key end

     0   :  { %vm39_vm0 = vcmask 1043456   ;;  %v167_v0 = vmov 0.0   ;;  %vm168_vm1 = vmmov 0   ;;  %vm35_vm2 = vcmask 818176   ;;  %s237_s1 = inlined_call_operand.vmem [shape: f32[100,128], index: 1, kind: input, shape index: {}]   ;;  %s238_s0 = inlined_call_operand.vmem [shape: f32[8,100], index: 0, kind: input, shape index: {}]   ;;  %s239_s2 = inlined_call_operand.vmem [shape: f32[1,128], index: 2, kind: input, shape index: {}]   ;;  %s240_s3 = inlined_call_operand.vmem [shape: f32[8,3], index: 3, kind: output, shape index: {}]  }
   0x1   :  { %136 = vmatprep.subr.mxu0 %v167_v0  ;;  %v27_v1 = vld [vmem:[%s237_s1 + $0x60] sm:$0xf]  ;;  %v26_v2 = vld [vmem:[%s237_s1 + $0x58] sm:$0xff]  ;;  %162 = vmatprep.mubr.msk.f32.mxu0 %vm168_vm1, %v167_v0  ;;  %v25_v3 = vld [vmem:[%s237_s1 + $0x50] sm:$0xff]  ;;  %vm113_vm3 = vcmask 23552  }
   0x2   :  { %137 = vmatpush3.msk.msra.mxu0 %vm39_vm0, %v27_v1  ;;  %v24_v4 = vld [vmem:[%s237_s1 + $0x48] sm:$0xff]  ;;  %v23_v5 = vld [vmem:[%s237_s1 + $0x40] sm:$0xff]  ;;  %v22_v6 = vld [vmem:[%s237_s1 + $0x38] sm:$0xff] }
   0x3   :  { %138 = vmatprep.subr.mxu0 %v167_v0  ;;  %v21_v7 = vld [vmem:[%s237_s1 + $0x30] sm:$0xff]  ;;  %v20_v8 = vld [vmem:[%s237_s1 + $0x28] sm:$0xff]  ;;  %v19_v9 = vld [vmem:[%s237_s1 + $0x20] sm:$0xff] }
   0x4   :  { %139 = vmatpush3.msra.mxu0 %v26_v2  ;;  %v18_v10 = vld [vmem:[%s237_s1 + $0x18] sm:$0xff]  ;;  %v17_v11 = vld [vmem:[%s237_s1 + $0x10] sm:$0xff]  ;;  %v16_v12 = vld [vmem:[%s237_s1 + $0x8] sm:$0xff] }
   0x5   :  { %140 = vmatprep.subr.mxu0 %v167_v0  ;;  %v15_v13 = vld [vmem:[%s237_s1] sm:$0xff] }
   0x6   :  { %141 = vmatpush3.msra.mxu0 %v25_v3  ;;  %v14_v14 = vld [vmem:[%s238_s0] sm:$0xff] }
   0x7   :  { %142 = vmatprep.subr.mxu0 %v167_v0  ;;  %v119_v15 = vld [vmem:[%s239_s2] ss:$0 sm:$0xff] }
   0x8   :  { %143 = vmatpush3.msra.mxu0 %v24_v4 }
   0x9   :  { %144 = vmatprep.subr.mxu0 %v167_v0 }
   0xa   :  { %145 = vmatpush3.msra.mxu0 %v23_v5 }
   0xb   :  { %146 = vmatprep.subr.mxu0 %v167_v0 }
   0xc   :  { %147 = vmatpush3.msra.mxu0 %v22_v6 }
   0xd   :  { %148 = vmatprep.subr.mxu0 %v167_v0 }
   0xe   :  { %149 = vmatpush3.msra.mxu0 %v21_v7 }
   0xf   :  { %150 = vmatprep.subr.mxu0 %v167_v0 }
  0x10   :  { %151 = vmatpush3.msra.mxu0 %v20_v8 }
  0x11   :  { %152 = vmatprep.subr.mxu0 %v167_v0 }
  0x12   :  { %153 = vmatpush3.msra.mxu0 %v19_v9 }
  0x13   :  { %154 = vmatprep.subr.mxu0 %v167_v0 }
  0x14   :  { %155 = vmatpush3.msra.mxu0 %v18_v10 }
  0x15   :  { %156 = vmatprep.subr.mxu0 %v167_v0 }
  0x16   :  { %157 = vmatpush3.msra.mxu0 %v17_v11 }
  0x17   :  { %158 = vmatprep.subr.mxu0 %v167_v0 }
  0x18   :  { %159 = vmatpush3.msra.mxu0 %v16_v12 }
  0x19   :  { %160 = vmatprep.subr.mxu0 %v167_v0 }
  0x1a   :  { %161 = vmatpush3.msra.mxu0 %v15_v13 }
  0x1b   :  { %163 = vmatmul.mubr.msk.f32.vlgmr.msra.gmra.mxu0 %vm35_vm2, %v14_v14 }
  0xdb   :  { %v109_v16 = vpop.f32.mrf.mxu0 }
  0xdc   :  { %v110_v17 = vadd.f32 %v119_v15, %v109_v16 }
  0xdd   :  { %v164_v18 = vpop.f32.mrf.mxu0 }
  0xde   :  { %114 = vst.msk [vmem:[%s240_s3] sm:$0xff] %vm113_vm3, %v110_v17 }

</bundles_post_ra>
